<compile_context>
chip_gen: v5e
topology: v5e:2x2
jax: 0.10.0
libtpu: 0.0.40
codegen_flags: <defaults>
</compile_context>

<pallas_src>
import jax
import jax.numpy as jnp
from jax.experimental import pallas as pl
from jax.experimental.pallas import tpu as pltpu


def _round_up(v, m):
    return ((v + m - 1) // m) * m


# ----------------------------- kernel bodies ------------------------------ #

def _fused_kernel(x_ref, w_ref, b_ref, o_ref):
    # x:(TN, K*D)  w:(K*D, KCp) block-diagonal  b:(1, KCp)  o:(TN, KCp)
    acc = jnp.dot(x_ref[...], w_ref[...], preferred_element_type=jnp.float32)
    o_ref[...] = (acc + b_ref[...].astype(jnp.float32)).astype(o_ref.dtype)


def _resident_kernel(x_ref, w_ref, b_ref, o_ref):
    # x:(TN, K*D)  w:(K, D, C)  b:(K, C)  o:(TN, K*C); K is static -> unrolled.
    K, D, C = w_ref.shape
    for k in range(K):
        acc = jnp.dot(x_ref[:, k * D:(k + 1) * D], w_ref[k],
                      preferred_element_type=jnp.float32)
        # Direct store into the k-th lane slice: bounds live ranges, no concat.
        o_ref[:, k * C:(k + 1) * C] = (
            acc + b_ref[k:k + 1, :].astype(jnp.float32)).astype(o_ref.dtype)


def _streamed_kernel(x_ref, w_ref, b_ref, o_ref):
    # Grid (K, N-tiles).  x:(TN, Dp)  w:(1, Dp, C)  b:(1, 1, C)  o:(1, TN, C)
    acc = jnp.dot(x_ref[...], w_ref[0], preferred_element_type=jnp.float32)
    o_ref[0] = (acc + b_ref[0].astype(jnp.float32)).astype(o_ref.dtype)


# ------------------------------- helpers ----------------------------------- #

def _vmem_budget():
    """(working-set budget for tile sizing, vmem_limit_bytes) — generation aware."""
    try:
        cap = int(pltpu.get_tpu_info().vmem_capacity_bytes)
    except Exception:
        cap = 64 * 1024 * 1024  # conservative default: v7x per-TensorCore VMEM
    limit = min(cap - 8 * 1024 * 1024, 100 * 1024 * 1024)
    limit = max(limit, 32 * 1024 * 1024)
    return int(limit * 0.7), int(limit)


def _resident_spec(block_shape, single_buffer):
    """BlockSpec for a VMEM-resident array (constant index_map)."""
    ndim = len(block_shape)
    idx = lambda *args: (0,) * ndim
    if single_buffer:
        # Constant index_map -> never re-fetched; one buffer is enough.
        return pl.BlockSpec(block_shape, idx, pipeline_mode=pl.Buffered(1))
    return pl.BlockSpec(block_shape, idx)


def _try_single_buffer(run):
    try:
        return run(True)    # weights/bias single-buffered
    except Exception:       # pl.Buffered(1) unsupported in this build -> default
        return run(False)


# ------------------------------- wrapper ----------------------------------- #

def multi_linear_probe(x, weights, biases, *, tile_n=None,
                       compute_dtype=jnp.bfloat16, mode="auto"):
    """x: (N, K, D); weights: (K, D, C); biases: (K, C) -> (N, K, C).

    compute_dtype: dtype x / weights are streamed in (accumulation is always
      f32).  Default bf16 (memory-bound op); pass jnp.float32 to match the f32
      PyTorch module numerics exactly.  Under jit the cast fuses upstream.
    mode: "auto" | "fused" | "resident" | "streamed".
    """
    N, K, D = x.shape
    Kw, Dw, C = weights.shape
    assert K == Kw and D == Dw, f"weights {weights.shape} mismatches x {x.shape}"
    assert biases.shape == (K, C), f"biases {biases.shape} != {(K, C)}"

    out_dtype = x.dtype
    budget, vmem_limit = _vmem_budget()
    w_item = jnp.dtype(compute_dtype).itemsize
    o_item = jnp.dtype(out_dtype).itemsize

    if mode == "auto":
        if K * D <= 512 and K * C <= 512:
            mode = "fused"
        elif 2 * (K * D * C + K * C) * w_item <= budget // 2:
            mode = "resident"
        else:
            mode = "streamed"

    x_c = x.astype(compute_dtype)
    w_c = weights.astype(compute_dtype)
    b_f32 = biases.astype(jnp.float32)

    def _pick_tile_n(lane_in_bytes, lane_out_bytes, resident_bytes):
        if tile_n is not None:
            t = int(tile_n)
        else:
            avail = max(budget - resident_bytes, budget // 4)
            row_bytes = 2 * (lane_in_bytes + lane_out_bytes)  # double-buffered tiles
            t = avail // row_bytes
            # Keep >=2 (ideally >=4) grid steps so both v7x TensorCores get work,
            # without forcing tiles below a good streaming size.
            t = min(t, max(256, _round_up(pl.cdiv(N, 4), 8)))
        t = min(t, _round_up(N, 8))
        return max(8, (t // 8) * 8)

    if mode == "fused":
        KC = K * C
        KCp = _round_up(KC, 128)  # lane-dense output -> unmasked vst
        eye = jnp.eye(K, dtype=compute_dtype)
        # Block-diagonal (K*D, K*C) weight: one MXU pass computes all K probes.
        w_bd = jnp.einsum("kdc,kj->kdjc", w_c, eye).reshape(K * D, KC)
        w_bd = jnp.pad(w_bd, ((0, 0), (0, KCp - KC)))
        b2 = jnp.pad(b_f32.reshape(1, KC), ((0, 0), (0, KCp - KC)))
        x2 = x_c.reshape(N, K * D)  # free contiguous reshape, no HBM pass

        def run(single_buffer):
            res_bytes = (1 if single_buffer else 2) * (
                w_bd.size * w_item + b2.size * 4)
            tn = _pick_tile_n(K * D * w_item, KCp * o_item, res_bytes)
            return pl.pallas_call(
                _fused_kernel,
                out_shape=jax.ShapeDtypeStruct((N, KCp), out_dtype),
                grid_spec=pltpu.PrefetchScalarGridSpec(
                    num_scalar_prefetch=0,
                    grid=(pl.cdiv(N, tn),),
                    in_specs=[pl.BlockSpec((tn, K * D), lambda n: (n, 0)),
                              _resident_spec((K * D, KCp), single_buffer),
                              _resident_spec((1, KCp), single_buffer)],
                    out_specs=pl.BlockSpec((tn, KCp), lambda n: (n, 0)),
                ),
                compiler_params=pltpu.CompilerParams(
                    dimension_semantics=("parallel",),
                    vmem_limit_bytes=vmem_limit),
            )(x2, w_bd, b2)

        out2 = _try_single_buffer(run)
        return out2[:, :KC].reshape(N, K, C)

    if mode == "resident":
        x2 = x_c.reshape(N, K * D)

        def run(single_buffer):
            res_bytes = (1 if single_buffer else 2) * (
                w_c.size * w_item + b_f32.size * 4)
            tn = _pick_tile_n(K * D * w_item, K * C * o_item, res_bytes)
            return pl.pallas_call(
                _resident_kernel,
                out_shape=jax.ShapeDtypeStruct((N, K * C), out_dtype),
                grid_spec=pltpu.PrefetchScalarGridSpec(
                    num_scalar_prefetch=0,
                    grid=(pl.cdiv(N, tn),),
                    in_specs=[pl.BlockSpec((tn, K * D), lambda n: (n, 0)),
                              _resident_spec((K, D, C), single_buffer),
                              _resident_spec((K, C), single_buffer)],
                    out_specs=pl.BlockSpec((tn, K * C), lambda n: (n, 0)),
                ),
                compiler_params=pltpu.CompilerParams(
                    dimension_semantics=("parallel",),
                    vmem_limit_bytes=vmem_limit),
            )(x2, w_c, b_f32)

        out2 = _try_single_buffer(run)
        return out2.reshape(N, K, C)

    if mode == "streamed":
        # Weights do not fit VMEM residency: tile over K as an outer grid axis
        # (weights streamed once; x re-read per probe — acceptable since the
        # weight stream dominates in this regime).
        Dp = _round_up(D, 128)
        xs, ws = x_c, w_c
        if Dp != D:
            # Zero-pad the contraction dim so x can be lane-tiled in D blocks.
            xs = jnp.pad(xs, ((0, 0), (0, 0), (0, Dp - D)))
            ws = jnp.pad(ws, ((0, 0), (0, Dp - D), (0, 0)))
        x2 = xs.reshape(N, K * Dp)
        b3 = b_f32.reshape(K, 1, C)

        res_bytes = 2 * (Dp * C * w_item + C * 4)  # double-buffered weight block
        tn = _pick_tile_n(Dp * w_item, C * o_item, res_bytes)
        out3 = pl.pallas_call(
            _streamed_kernel,
            out_shape=jax.ShapeDtypeStruct((K, N, C), out_dtype),
            grid_spec=pltpu.PrefetchScalarGridSpec(
                num_scalar_prefetch=0,
                grid=(K, pl.cdiv(N, tn)),
                in_specs=[pl.BlockSpec((tn, Dp), lambda k, n: (n, k)),
                          pl.BlockSpec((1, Dp, C), lambda k, n: (k, 0, 0)),
                          pl.BlockSpec((1, 1, C), lambda k, n: (k, 0, 0))],
                out_specs=pl.BlockSpec((1, tn, C), lambda k, n: (k, n, 0)),
            ),
            compiler_params=pltpu.CompilerParams(
                dimension_semantics=("arbitrary", "parallel"),
                vmem_limit_bytes=vmem_limit),
        )(x2, ws, b3)
        # Output is tiny relative to the weight stream here; transpose is cheap.
        return jnp.transpose(out3, (1, 0, 2))

    raise ValueError(f"unknown mode {mode!r}")


if __name__ == "__main__":
    # N tokens, K probes, D model dim, C classes — small shapes; N % tile_n != 0
    # exercises the ragged (masked) last grid block with no jnp.pad of x.
    N, K, D, C = 20, 4, 32, 16

    key = jax.random.PRNGKey(0)
    kx, kw, kb = jax.random.split(key, 3)
    x = jax.random.normal(kx, (N, K, D), dtype=jnp.float32)
    bound = 1.0 / (D ** 0.5)  # nn.Linear-style uniform init
    weights = jax.random.uniform(kw, (K, D, C), minval=-bound, maxval=bound,
                                 dtype=jnp.float32)
    biases = jax.random.uniform(kb, (K, C), minval=-bound, maxval=bound,
                                dtype=jnp.float32)

    ref = jnp.einsum("nkd,kdc->nkc", x, weights) + biases[None, :, :]

    # Default path: fused block-diagonal matmul, bf16 streaming, auto tile_n.
    out = jax.block_until_ready(multi_linear_probe(x, weights, biases))
    assert out.shape == (N, K, C)
    assert jnp.allclose(out, ref, atol=1e-1, rtol=5e-2), "bf16 fused path mismatch"

    # f32 end-to-end (matches the f32 PyTorch module), ragged multi-step grid.
    out_f32 = jax.block_until_ready(
        multi_linear_probe(x, weights, biases, compute_dtype=jnp.float32, tile_n=8))
    assert jnp.allclose(out_f32, ref, atol=2e-2, rtol=2e-2), "f32 fused path mismatch"

    # Per-probe VMEM-resident path (used for larger K*D / K*C shapes).
    out_res = jax.block_until_ready(
        multi_linear_probe(x, weights, biases, compute_dtype=jnp.float32,
                           mode="resident"))
    assert jnp.allclose(out_res, ref, atol=2e-2, rtol=2e-2), "resident path mismatch"

    # Weight-streaming fallback path (used when weights don't fit in VMEM).
    out_str = jax.block_until_ready(
        multi_linear_probe(x, weights, biases, compute_dtype=jnp.float32,
                           mode="streamed"))
    assert jnp.allclose(out_str, ref, atol=2e-2, rtol=2e-2), "streamed path mismatch"

    print("KERNEL_OK")
</pallas_src>

<mosaic_0001>
module attributes {stable_mosaic.version = 11 : i64} {
  func.func @_fused_kernel(%arg0: i32, %arg1: memref<24x128xbf16, #tpu.memory_space<vmem>>, %arg2: memref<128x128xbf16, #tpu.memory_space<vmem>>, %arg3: memref<1x128xf32, #tpu.memory_space<vmem>>, %arg4: memref<24x128xf32, #tpu.memory_space<vmem>>) attributes {dimension_semantics = [#tpu.dimension_semantics<parallel>], iteration_bounds = array<i64: 1>, scalar_prefetch = 0 : i64, scratch_operands = 0 : i64, tpu.core_type = #tpu.core_type<tc>, window_params = [{transform_indices = @transform_0, window_bounds = array<i64: 24, 128>}, {pipeline_mode = #tpu.pipeline_mode<synchronous>, transform_indices = @transform_1, window_bounds = array<i64: 128, 128>}, {pipeline_mode = #tpu.pipeline_mode<synchronous>, transform_indices = @transform_2, window_bounds = array<i64: 1, 128>}, {transform_indices = @transform_3, window_bounds = array<i64: 24, 128>}]} {
    %c0 = arith.constant 0 : index
    %c0_0 = arith.constant 0 : index
    %0 = vector.load %arg1[%c0, %c0_0] : memref<24x128xbf16, #tpu.memory_space<vmem>>, vector<24x128xbf16>
    %c0_1 = arith.constant 0 : index
    %c0_2 = arith.constant 0 : index
    %1 = vector.load %arg2[%c0_1, %c0_2] : memref<128x128xbf16, #tpu.memory_space<vmem>>, vector<128x128xbf16>
    %cst = arith.constant dense<0.000000e+00> : vector<24x128xf32>
    %2 = tpu.matmul %0, %1, %cst {dimension_numbers = #tpu.dot_dimension_numbers<[1], [0], [0], [1], [0, 0, 1, 1], [], []>} : vector<24x128xbf16>, vector<128x128xbf16>, vector<24x128xf32> -> vector<24x128xf32>
    %c0_3 = arith.constant 0 : index
    %c0_4 = arith.constant 0 : index
    %3 = vector.load %arg3[%c0_3, %c0_4] : memref<1x128xf32, #tpu.memory_space<vmem>>, vector<1x128xf32>
    %4 = vector.broadcast %3 : vector<1x128xf32> to vector<24x128xf32>
    %5 = arith.addf %2, %4 : vector<24x128xf32>
    %c0_5 = arith.constant 0 : index
    %c0_6 = arith.constant 0 : index
    %6 = vector.load %arg4[%c0_5, %c0_6] : memref<24x128xf32, #tpu.memory_space<vmem>>, vector<24x128xf32>
    tpu.vector_store %arg4[%c0_5, %c0_6], %5 {strides = array<i32>} : memref<24x128xf32, #tpu.memory_space<vmem>>, vector<24x128xf32>,
    return
  }
  func.func @transform_0(%arg0: i32) -> (i32, i32) {
    %c0_i32 = arith.constant 0 : i32
    %c0_i32_0 = arith.constant 0 : i32
    return %arg0, %c0_i32 : i32, i32
  }
  func.func @transform_1(%arg0: i32) -> (i32, i32) {
    %c0_i32 = arith.constant 0 : i32
    %c0_i32_0 = arith.constant 0 : i32
    %c0_i32_1 = arith.constant 0 : i32
    return %c0_i32, %c0_i32_0 : i32, i32
  }
  func.func @transform_2(%arg0: i32) -> (i32, i32) {
    %c0_i32 = arith.constant 0 : i32
    %c0_i32_0 = arith.constant 0 : i32
    %c0_i32_1 = arith.constant 0 : i32
    return %c0_i32, %c0_i32_0 : i32, i32
  }
  func.func @transform_3(%arg0: i32) -> (i32, i32) {
    %c0_i32 = arith.constant 0 : i32
    %c0_i32_0 = arith.constant 0 : i32
    return %arg0, %c0_i32 : i32, i32
  }
}

module attributes {stable_mosaic.version = 11 : i64} {
  func.func @_fused_kernel(%arg0: i32, %arg1: memref<24x128xbf16, #tpu.memory_space<vmem>>, %arg2: memref<128x128xbf16, #tpu.memory_space<vmem>>, %arg3: memref<1x128xf32, #tpu.memory_space<vmem>>, %arg4: memref<24x128xf32, #tpu.memory_space<vmem>>) attributes {dimension_semantics = [#tpu.dimension_semantics<parallel>], iteration_bounds = array<i64: 1>, scalar_prefetch = 0 : i64, scratch_operands = 0 : i64, tpu.core_type = #tpu.core_type<tc>, window_params = [{transform_indices = @transform_0, window_bounds = array<i64: 24, 128>}, {pipeline_mode = #tpu.pipeline_mode<synchronous>, transform_indices = @transform_1, window_bounds = array<i64: 128, 128>}, {pipeline_mode = #tpu.pipeline_mode<synchronous>, transform_indices = @transform_2, window_bounds = array<i64: 1, 128>}, {transform_indices = @transform_3, window_bounds = array<i64: 24, 128>}]} {
    %c0 = arith.constant 0 : index
    %c0_0 = arith.constant 0 : index
    %0 = vector.load %arg1[%c0, %c0_0] : memref<24x128xbf16, #tpu.memory_space<vmem>>, vector<24x128xbf16>
    %c0_1 = arith.constant 0 : index
    %c0_2 = arith.constant 0 : index
    %1 = vector.load %arg2[%c0_1, %c0_2] : memref<128x128xbf16, #tpu.memory_space<vmem>>, vector<128x128xbf16>
    %cst = arith.constant dense<0.000000e+00> : vector<24x128xf32>
    %2 = tpu.matmul %0, %1, %cst {dimension_numbers = #tpu.dot_dimension_numbers<[1], [0], [0], [1], [0, 0, 1, 1], [], []>} : vector<24x128xbf16>, vector<128x128xbf16>, vector<24x128xf32> -> vector<24x128xf32>
    %c0_3 = arith.constant 0 : index
    %c0_4 = arith.constant 0 : index
    %3 = vector.load %arg3[%c0_3, %c0_4] : memref<1x128xf32, #tpu.memory_space<vmem>>, vector<1x128xf32>
    %4 = vector.broadcast %3 : vector<1x128xf32> to vector<24x128xf32>
    %5 = arith.addf %2, %4 : vector<24x128xf32>
    %c0_5 = arith.constant 0 : index
    %c0_6 = arith.constant 0 : index
    %6 = vector.load %arg4[%c0_5, %c0_6] : memref<24x128xf32, #tpu.memory_space<vmem>>, vector<24x128xf32>
    tpu.vector_store %arg4[%c0_5, %c0_6], %5 {strides = array<i32>} : memref<24x128xf32, #tpu.memory_space<vmem>>, vector<24x128xf32>,
    return
  }
  func.func @transform_0(%arg0: i32) -> (i32, i32) {
    %c0_i32 = arith.constant 0 : i32
    %c0_i32_0 = arith.constant 0 : i32
    return %arg0, %c0_i32 : i32, i32
  }
  func.func @transform_1(%arg0: i32) -> (i32, i32) {
    %c0_i32 = arith.constant 0 : i32
    %c0_i32_0 = arith.constant 0 : i32
    %c0_i32_1 = arith.constant 0 : i32
    return %c0_i32, %c0_i32_0 : i32, i32
  }
  func.func @transform_2(%arg0: i32) -> (i32, i32) {
    %c0_i32 = arith.constant 0 : i32
    %c0_i32_0 = arith.constant 0 : i32
    %c0_i32_1 = arith.constant 0 : i32
    return %c0_i32, %c0_i32_0 : i32, i32
  }
  func.func @transform_3(%arg0: i32) -> (i32, i32) {
    %c0_i32 = arith.constant 0 : i32
    %c0_i32_0 = arith.constant 0 : i32
    return %arg0, %c0_i32 : i32, i32
  }
}

</mosaic_0001>

<bundles_post_ra>
// kernel: tpu_custom_call.1
= control target key start
LH: loop header
LB: loop body
LE: loop exit
PB: predicated region body
PF: predicated region fallthrough
CT: control target
= control target key end

     0   :  { %8 = vsyncpa [#allocation3], 0  ;;  %s347_s0 = inlined_call_operand.hbm [shape: bf16[20,128], index: 0, kind: input, shape index: {}]   ;;  %s348_s1 = inlined_call_operand.hbm [shape: bf16[128,128], index: 1, kind: input, shape index: {}]   ;;  %s349_s2 = inlined_call_operand.vmem [shape: f32[1,128], index: 2, kind: input, shape index: {}]   ;;  %s350_s3 = inlined_call_operand.hbm [shape: f32[20,128], index: 3, kind: output, shape index: {}]  }
   0x1   :  { %9 = vsyncpa [#allocation6], 0 }
   0x2   :  { %10 = vsyncpa [#allocation4], 0  ;;  %s15_s14 = sshll.u32 %s347_s0, 4  ;;  %s308_s15 = smov [#allocation2]   ;;  %s16_s14 = int_to_ptr.hbm [resolvable:$true] %s15_s14 }
   0x3   :  { %s17_s16 = sshll.u32 %s308_s15, 4  ;;  %s28_s19 = sshll.u32 %s348_s1, 4  ;;  %s18_s16 = int_to_ptr.vmem [resolvable:$true] %s17_s16  ;;  %s29_s19 = int_to_ptr.hbm [resolvable:$true] %s28_s19 }
   0x4   :  { %s309_s20 = smov 64   ;;  %s310_s21 = smov 4  }
   0x5   :  { %23 = dma.hbm_to_vmem [thread:$0]  %s16_s14, 192, %s18_s16, [#allocation3], %s309_s20, %s309_s20, %s310_s21  }
   0x6   :  { %s311_s22 = smov [#allocation5]  }
   0x7   :  { %s30_s23 = sshll.u32 %s311_s22, 4  ;;  %s31_s23 = int_to_ptr.vmem [resolvable:$true] %s30_s23 }
   0x8   :  { %36 = dma.hbm_to_vmem [thread:$0]  %s29_s19, 1024, %s31_s23, [#allocation6], %s309_s20, %s309_s20, %s310_s21  }
   0x9   :  { %302 = dma.done.wait [#allocation3], 192  }
   0xa   :  { %303 = vsyncadd [#allocation3], 4294967104 }
   0xb   :  { %304 = dma.done.wait [#allocation6], 1024  }
   0xc   :  { %305 = vsyncadd [#allocation6], 4294966272  ;;  %v213_v0 = vld [vmem:[#allocation5 + $0x38] sm:$0xff]  ;;  %v212_v1 = vld [vmem:[#allocation5 + $0x30] sm:$0xff]  ;;  %s312_s24 = smov [#allocation7]   ;;  %s155_s28 = sshll.u32 %s350_s3, 4  ;;  %s156_s28 = int_to_ptr.hbm [resolvable:$true] %s155_s28 }
   0xd   :  { %128 = vmatpush.bf16.msra.mxu0 %v213_v0  ;;  %214 = vmatpush.bf16.msra.mxu1 %v213_v0  ;;  %v211_v2 = vld [vmem:[#allocation5 + $0x28] sm:$0xff]  ;;  %v210_v3 = vld [vmem:[#allocation5 + $0x20] sm:$0xff]  ;;  %v209_v4 = vld [vmem:[#allocation5 + $0x18] sm:$0xff]  ;;  %s153_s25 = sshll.u32 %s312_s24, 4  ;;  %s313_s29 = smov 128   ;;  %s154_s25 = int_to_ptr.vmem [resolvable:$true] %s153_s25 }
   0xe   :  { %v208_v5 = vld [vmem:[#allocation5 + $0x10] sm:$0xff]  ;;  %v207_v6 = vld [vmem:[#allocation5 + $0x8] sm:$0xff]  ;;  %v49_v7 = vld [vmem:[#allocation2 + $0x8] sm:$0xf] }
   0xf   :  { %v75_v8 = vunpack.c.l.b16 %v49_v7  ;;  %v206_v9 = vld [vmem:[#allocation5] sm:$0xff]  ;;  %v205_v10 = vld [vmem:[#allocation2] sm:$0xff] }
  0x10   :  { %v229_v12 = vld [vmem:[%s349_s2] ss:$0 sm:$0xff]  ;;  %s314_s2 = smov 8  }
  0x11   :  { %129 = vmatpush.bf16.msra.mxu0 %v212_v1  ;;  %215 = vmatpush.bf16.msra.mxu1 %v212_v1  ;;  %v77_v11 = vpack.c.b16 %v75_v8, %v75_v8 }
  0x15   :  { %130 = vmatpush.bf16.msra.mxu0 %v211_v2  ;;  %216 = vmatpush.bf16.msra.mxu1 %v211_v2 }
  0x19   :  { %131 = vmatpush.bf16.msra.mxu0 %v210_v3  ;;  %217 = vmatpush.bf16.msra.mxu1 %v210_v3 }
  0x1d   :  { %132 = vmatpush.bf16.msra.mxu0 %v209_v4  ;;  %218 = vmatpush.bf16.msra.mxu1 %v209_v4 }
  0x21   :  { %133 = vmatpush.bf16.msra.mxu0 %v208_v5  ;;  %219 = vmatpush.bf16.msra.mxu1 %v208_v5 }
  0x25   :  { %134 = vmatpush.bf16.msra.mxu0 %v207_v6  ;;  %220 = vmatpush.bf16.msra.mxu1 %v207_v6 }
  0x29   :  { %135 = vmatpush.bf16.msra.mxu0 %v206_v9  ;;  %221 = vmatpush.bf16.msra.mxu1 %v206_v9 }
  0x2c   :  { %136 = vmatmul.bf16.vlgmr.msra.gmra.mxu0 %v205_v10  ;;  %141 = vmatmul.bf16.vlgmr.msra.gmra.mxu1 %v77_v11 }
  0xa9   :  { %v137_v13 = vpop.f32.mrf.mxu0  ;;  %v142_v14 = vpop.f32.mrf.mxu1 }
  0xaa   :  { %v138_v15 = vadd.f32 %v229_v12, %v137_v13  ;;  %v143_v16 = vadd.f32 %v229_v12, %v142_v14 }
  0xac   :  { %146 = vst [vmem:[#allocation7] sm:$0xff] %v138_v15 }
  0xad   :  { %148 = vst [vmem:[#allocation7 + $0x10] sm:$0xff] %v143_v16 }
  0xb1   :  { %v139_v17 = vpop.f32.mrf.mxu0  ;;  %v144_v18 = vpop.f32.mrf.mxu1 }
  0xb2   :  { %v140_v19 = vadd.f32 %v229_v12, %v139_v17 }
  0xb4   :  { %147 = vst [vmem:[#allocation7 + $0x8] sm:$0xff] %v140_v19 }
  0xb5   :  { %161 = dma.vmem_to_hbm [thread:$0]  %s154_s25, 384, %s156_s28, [#allocation4], %s313_s29, %s313_s29, %s314_s2  }
  0xb6   :  { %306 = dma.done.wait [#allocation4], 384  }
  0xb7   :  { %307 = vsyncadd [#allocation4], 4294966912 }
  0xb8   :  { %166 = vsyncpa [#allocation3], 1 }
  0xb9   :  { %167 = vsyncpa [#allocation6], 1 }
  0xba   :  { %168 = vsyncpa [#allocation4], 1 }

// kernel: tpu_custom_call.1
= control target key start
LH: loop header
LB: loop body
LE: loop exit
PB: predicated region body
PF: predicated region fallthrough
CT: control target
= control target key end

     0   :  { %8 = vsyncpa [#allocation3], 0  ;;  %s347_s0 = inlined_call_operand.hbm [shape: bf16[20,128], index: 0, kind: input, shape index: {}]   ;;  %s348_s1 = inlined_call_operand.hbm [shape: bf16[128,128], index: 1, kind: input, shape index: {}]   ;;  %s349_s2 = inlined_call_operand.vmem [shape: f32[1,128], index: 2, kind: input, shape index: {}]   ;;  %s350_s3 = inlined_call_operand.hbm [shape: f32[20,128], index: 3, kind: output, shape index: {}]  }
   0x1   :  { %9 = vsyncpa [#allocation6], 0 }
   0x2   :  { %10 = vsyncpa [#allocation4], 0  ;;  %s15_s14 = sshll.u32 %s347_s0, 4  ;;  %s308_s15 = smov [#allocation2]   ;;  %s16_s14 = int_to_ptr.hbm [resolvable:$true] %s15_s14 }
   0x3   :  { %s17_s16 = sshll.u32 %s308_s15, 4  ;;  %s28_s19 = sshll.u32 %s348_s1, 4  ;;  %s18_s16 = int_to_ptr.vmem [resolvable:$true] %s17_s16  ;;  %s29_s19 = int_to_ptr.hbm [resolvable:$true] %s28_s19 }
   0x4   :  { %s309_s20 = smov 64   ;;  %s310_s21 = smov 4  }
   0x5   :  { %23 = dma.hbm_to_vmem [thread:$0]  %s16_s14, 192, %s18_s16, [#allocation3], %s309_s20, %s309_s20, %s310_s21  }
   0x6   :  { %s311_s22 = smov [#allocation5]  }
   0x7   :  { %s30_s23 = sshll.u32 %s311_s22, 4  ;;  %s31_s23 = int_to_ptr.vmem [resolvable:$true] %s30_s23 }
   0x8   :  { %36 = dma.hbm_to_vmem [thread:$0]  %s29_s19, 1024, %s31_s23, [#allocation6], %s309_s20, %s309_s20, %s310_s21  }
   0x9   :  { %302 = dma.done.wait [#allocation3], 192  }
   0xa   :  { %303 = vsyncadd [#allocation3], 4294967104 }
   0xb   :  { %304 = dma.done.wait [#allocation6], 1024  }
   0xc   :  { %305 = vsyncadd [#allocation6], 4294966272  ;;  %v213_v0 = vld [vmem:[#allocation5 + $0x38] sm:$0xff]  ;;  %v212_v1 = vld [vmem:[#allocation5 + $0x30] sm:$0xff]  ;;  %s312_s24 = smov [#allocation7]   ;;  %s155_s28 = sshll.u32 %s350_s3, 4  ;;  %s156_s28 = int_to_ptr.hbm [resolvable:$true] %s155_s28 }
   0xd   :  { %128 = vmatpush.bf16.msra.mxu0 %v213_v0  ;;  %214 = vmatpush.bf16.msra.mxu1 %v213_v0  ;;  %v211_v2 = vld [vmem:[#allocation5 + $0x28] sm:$0xff]  ;;  %v210_v3 = vld [vmem:[#allocation5 + $0x20] sm:$0xff]  ;;  %v209_v4 = vld [vmem:[#allocation5 + $0x18] sm:$0xff]  ;;  %s153_s25 = sshll.u32 %s312_s24, 4  ;;  %s313_s29 = smov 128   ;;  %s154_s25 = int_to_ptr.vmem [resolvable:$true] %s153_s25 }
   0xe   :  { %v208_v5 = vld [vmem:[#allocation5 + $0x10] sm:$0xff]  ;;  %v207_v6 = vld [vmem:[#allocation5 + $0x8] sm:$0xff]  ;;  %v49_v7 = vld [vmem:[#allocation2 + $0x8] sm:$0xf] }
   0xf   :  { %v75_v8 = vunpack.c.l.b16 %v49_v7  ;;  %v206_v9 = vld [vmem:[#allocation5] sm:$0xff]  ;;  %v205_v10 = vld [vmem:[#allocation2] sm:$0xff] }
  0x10   :  { %v229_v12 = vld [vmem:[%s349_s2] ss:$0 sm:$0xff]  ;;  %s314_s2 = smov 8  }
  0x11   :  { %129 = vmatpush.bf16.msra.mxu0 %v212_v1  ;;  %215 = vmatpush.bf16.msra.mxu1 %v212_v1  ;;  %v77_v11 = vpack.c.b16 %v75_v8, %v75_v8 }
  0x15   :  { %130 = vmatpush.bf16.msra.mxu0 %v211_v2  ;;  %216 = vmatpush.bf16.msra.mxu1 %v211_v2 }
  0x19   :  { %131 = vmatpush.bf16.msra.mxu0 %v210_v3  ;;  %217 = vmatpush.bf16.msra.mxu1 %v210_v3 }
  0x1d   :  { %132 = vmatpush.bf16.msra.mxu0 %v209_v4  ;;  %218 = vmatpush.bf16.msra.mxu1 %v209_v4 }
  0x21   :  { %133 = vmatpush.bf16.msra.mxu0 %v208_v5  ;;  %219 = vmatpush.bf16.msra.mxu1 %v208_v5 }
  0x25   :  { %134 = vmatpush.bf16.msra.mxu0 %v207_v6  ;;  %220 = vmatpush.bf16.msra.mxu1 %v207_v6 }
  0x29   :  { %135 = vmatpush.bf16.msra.mxu0 %v206_v9  ;;  %221 = vmatpush.bf16.msra.mxu1 %v206_v9 }
  0x2c   :  { %136 = vmatmul.bf16.vlgmr.msra.gmra.mxu0 %v205_v10  ;;  %141 = vmatmul.bf16.vlgmr.msra.gmra.mxu1 %v77_v11 }
  0xa9   :  { %v137_v13 = vpop.f32.mrf.mxu0  ;;  %v142_v14 = vpop.f32.mrf.mxu1 }
  0xaa   :  { %v138_v15 = vadd.f32 %v229_v12, %v137_v13  ;;  %v143_v16 = vadd.f32 %v229_v12, %v142_v14 }
  0xac   :  { %146 = vst [vmem:[#allocation7] sm:$0xff] %v138_v15 }
  0xad   :  { %148 = vst [vmem:[#allocation7 + $0x10] sm:$0xff] %v143_v16 }
  0xb1   :  { %v139_v17 = vpop.f32.mrf.mxu0  ;;  %v144_v18 = vpop.f32.mrf.mxu1 }
  0xb2   :  { %v140_v19 = vadd.f32 %v229_v12, %v139_v17 }
  0xb4   :  { %147 = vst [vmem:[#allocation7 + $0x8] sm:$0xff] %v140_v19 }
  0xb5   :  { %161 = dma.vmem_to_hbm [thread:$0]  %s154_s25, 384, %s156_s28, [#allocation4], %s313_s29, %s313_s29, %s314_s2  }
  0xb6   :  { %306 = dma.done.wait [#allocation4], 384  }
  0xb7   :  { %307 = vsyncadd [#allocation4], 4294966912 }
  0xb8   :  { %166 = vsyncpa [#allocation3], 1 }
  0xb9   :  { %167 = vsyncpa [#allocation6], 1 }
  0xba   :  { %168 = vsyncpa [#allocation4], 1 }

</bundles_post_ra>
